<compile_context>
chip_gen: v7x
topology: tpu7x:2x2x1
jax: 0.10.0
libtpu: 0.0.40
codegen_flags: <defaults>
</compile_context>

<pallas_src>
import functools

import jax
import jax.numpy as jnp
from jax.experimental import pallas as pl
from jax.experimental.pallas import tpu as pltpu


def _masked_conv1d_kernel(x_ref, m_ref, w_ref, b_ref, o_ref, *, ksize, pad,
                          matmul_dtype=None):
    Bb, T, Cin = x_ref.shape
    Cout = o_ref.shape[-1]
    N = Bb * T

    X = x_ref[...].reshape(N, Cin)          # (N, Cin): folded batch*time rows
    W = w_ref[...]                          # (Cin, K*Cout): tap k at [k*Cout:(k+1)*Cout]
    if matmul_dtype is not None:            # optional bf16 MXU path (v6e/v7x)
        X = X.astype(matmul_dtype)
        W = W.astype(matmul_dtype)

    # Single fused matmul for all K taps.
    Y = jnp.dot(X, W, preferred_element_type=jnp.float32)      # (N, K*Cout)

    # Time index within each folded batch row-block. Used to zero-pad the conv at the
    # time boundaries; it also kills the rows a roll would bleed across batch elements.
    t = jax.lax.broadcasted_iota(jnp.int32, (Bb, T, 1), 1).reshape(N, 1)

    acc = Y[:, pad * Cout:(pad + 1) * Cout]                     # center tap (no shift)
    for k in range(ksize):
        d = k - pad                                             # out[t] takes x[t + d] @ W_k
        if d == 0:
            continue
        # result[t] = Y_k[t + d]  (circular), then zero the wrapped/padded rows.
        Ck = pltpu.roll(Y[:, k * Cout:(k + 1) * Cout], shift=(-d) % N, axis=0)
        if d < 0:
            Ck = jnp.where(t >= -d, Ck, 0.0)
        else:
            Ck = jnp.where(t <= (T - 1) - d, Ck, 0.0)
        acc = acc + Ck

    acc = acc + b_ref[...]                                      # (1, Cout) broadcast
    acc = acc * m_ref[...].reshape(N, 1)                        # masked output (as in PyTorch)
    o_ref[...] = acc.reshape(Bb, T, Cout).astype(o_ref.dtype)


def _pick_batch_block(B, T):
    """Fold batch rows into one grid step for MXU fill / per-step overhead amortization,
    but keep >= 2 grid steps when B >= 2 so the 'parallel' axis feeds both v7x cores."""
    best = 1
    for d in range(1, B + 1):
        if B % d != 0:
            continue
        if d * T > 2048:
            break
        if B >= 2 and B // d < 2:
            continue
        best = d
    return best


def masked_conv1d_forward(x, mask, weight, bias, *, stride=1, matmul_dtype=None):
    """x: (B, Cin, T) f32, mask: (B, 1, T) bool, weight: (Cout, Cin, K) (PyTorch Conv1d
    layout, K odd), bias: (Cout,).  Returns (out (B, Cout, T//stride) masked,
    out_mask (B, 1, T//stride) bool) -- matches MaskedConv1D.forward."""
    B, Cin, T = x.shape
    Cout, Cin_w, K = weight.shape
    assert Cin_w == Cin and K % 2 == 1
    pad = K // 2
    assert T % stride == 0

    # Layout plumbing: time on sublanes, channels on lanes; fused tap weights.
    xt = jnp.transpose(x, (0, 2, 1))                                  # (B, T, Cin)
    m = mask[:, 0, :].astype(x.dtype)[:, :, None]                     # (B, T, 1)
    # w_all[:, k*Cout + o] = weight[o, :, k]
    w_all = jnp.transpose(weight, (1, 2, 0)).reshape(Cin, K * Cout)   # (Cin, K*Cout)
    b2 = bias[None, :].astype(jnp.float32)                            # (1, Cout)

    B_blk = _pick_batch_block(B, T)
    grid = (B // B_blk,)

    kernel = functools.partial(_masked_conv1d_kernel, ksize=K, pad=pad,
                               matmul_dtype=matmul_dtype)

    grid_spec = pltpu.PrefetchScalarGridSpec(
        num_scalar_prefetch=0,
        grid=grid,
        in_specs=[
            pl.BlockSpec((B_blk, T, Cin), lambda i: (i, 0, 0)),
            pl.BlockSpec((B_blk, T, 1), lambda i: (i, 0, 0)),
            pl.BlockSpec((Cin, K * Cout), lambda i: (0, 0)),
            pl.BlockSpec((1, Cout), lambda i: (0, 0)),
        ],
        out_specs=pl.BlockSpec((B_blk, T, Cout), lambda i: (i, 0, 0)),
    )

    y = pl.pallas_call(
        kernel,
        out_shape=jax.ShapeDtypeStruct((B, T, Cout), x.dtype),
        grid_spec=grid_spec,
        compiler_params=pltpu.CompilerParams(dimension_semantics=("parallel",)),
    )(xt, m, w_all, b2)

    y = jnp.transpose(y, (0, 2, 1))                                   # (B, Cout, T)
    if stride > 1:
        # A stride-s conv output is the stride-1 output sampled at t = j*s, and PyTorch's
        # nearest interpolation of the mask to length T//s is exactly mask[:, :, ::s], so
        # subsampling the already-masked full-resolution result is bit-identical.
        # TODO(synk): compute only the strided rows in-kernel for large stride factors.
        y = y[:, :, ::stride]
        out_mask = mask[:, :, ::stride]
    else:
        out_mask = mask
    return y, out_mask


def ref_forward(x, mask, weight, bias, *, stride=1):
    """Pure-JAX reference mirroring the PyTorch MaskedConv1D forward."""
    B, Cin, T = x.shape
    Cout, _, K = weight.shape
    pad = K // 2
    out = jax.lax.conv_general_dilated(
        x, weight, window_strides=(stride,), padding=[(pad, pad)],
        dimension_numbers=('NCH', 'OIH', 'NCH'))
    out = out + bias[None, :, None]
    Tout = out.shape[-1]
    if stride > 1:
        src = (jnp.arange(Tout) * T) // Tout          # F.interpolate(mode='nearest')
        m = mask[:, :, src].astype(x.dtype)
    else:
        m = mask.astype(x.dtype)
    out = out * m
    return out, m.astype(bool)


if __name__ == "__main__":
    B, Cin, Cout, T, K = 2, 4, 8, 16, 3
    key = jax.random.PRNGKey(0)
    kx, kw, kb = jax.random.split(key, 3)

    x = jax.random.normal(kx, (B, Cin, T), jnp.float32)
    bound = 1.0 / (Cin * K) ** 0.5
    weight = jax.random.uniform(kw, (Cout, Cin, K), jnp.float32, -bound, bound)
    bias = jax.random.uniform(kb, (Cout,), jnp.float32, -bound, bound)

    lengths = jnp.array([T, 10])
    mask = jnp.arange(T)[None, None, :] < lengths[:, None, None]      # (B, 1, T) bool

    # stride = 1
    out, out_mask = masked_conv1d_forward(x, mask, weight, bias, stride=1)
    out = jax.block_until_ready(out)
    out_mask = jax.block_until_ready(out_mask)
    ref_out, ref_mask = ref_forward(x, mask, weight, bias, stride=1)
    assert out.shape == (B, Cout, T) and out_mask.shape == (B, 1, T)
    err = float(jnp.max(jnp.abs(out - ref_out)))
    assert jnp.allclose(out, ref_out, rtol=1e-4, atol=1e-4), err
    assert bool(jnp.array_equal(out_mask, ref_mask))

    # stride = 2 (downsampling path: strided output + nearest-interpolated mask)
    out2, out_mask2 = masked_conv1d_forward(x, mask, weight, bias, stride=2)
    out2 = jax.block_until_ready(out2)
    ref2, refm2 = ref_forward(x, mask, weight, bias, stride=2)
    assert out2.shape == (B, Cout, T // 2) and out_mask2.shape == (B, 1, T // 2)
    err2 = float(jnp.max(jnp.abs(out2 - ref2)))
    assert jnp.allclose(out2, ref2, rtol=1e-4, atol=1e-4), err2
    assert bool(jnp.array_equal(out_mask2, refm2))

    print("KERNEL_OK")
</pallas_src>

<mosaic_0001>
module attributes {stable_mosaic.version = 11 : i64} {
  func.func @_masked_conv1d_kernel(%arg0: i32, %arg1: memref<1x16x4xf32, #tpu.memory_space<vmem>>, %arg2: memref<1x16x1xf32, #tpu.memory_space<vmem>>, %arg3: memref<4x24xf32, #tpu.memory_space<vmem>>, %arg4: memref<1x8xf32, #tpu.memory_space<vmem>>, %arg5: memref<1x16x8xf32, #tpu.memory_space<vmem>>) attributes {dimension_semantics = [#tpu.dimension_semantics<parallel>], iteration_bounds = array<i64: 2>, scalar_prefetch = 0 : i64, scratch_operands = 0 : i64, tpu.core_type = #tpu.core_type<tc>, window_params = [{transform_indices = @transform_0, window_bounds = array<i64: 1, 16, 4>}, {transform_indices = @transform_1, window_bounds = array<i64: 1, 16, 1>}, {pipeline_mode = #tpu.pipeline_mode<synchronous>, transform_indices = @transform_2, window_bounds = array<i64: 4, 24>}, {pipeline_mode = #tpu.pipeline_mode<synchronous>, transform_indices = @transform_3, window_bounds = array<i64: 1, 8>}, {transform_indices = @transform_4, window_bounds = array<i64: 1, 16, 8>}]} {
    %c0 = arith.constant 0 : index
    %c0_0 = arith.constant 0 : index
    %c0_1 = arith.constant 0 : index
    %0 = vector.load %arg1[%c0, %c0_0, %c0_1] : memref<1x16x4xf32, #tpu.memory_space<vmem>>, vector<1x16x4xf32>
    %1 = vector.shape_cast %0 : vector<1x16x4xf32> to vector<16x4xf32>
    %c0_2 = arith.constant 0 : index
    %c0_3 = arith.constant 0 : index
    %2 = vector.load %arg3[%c0_2, %c0_3] : memref<4x24xf32, #tpu.memory_space<vmem>>, vector<4x24xf32>
    %cst = arith.constant dense<0.000000e+00> : vector<16x24xf32>
    %3 = tpu.matmul %1, %2, %cst {dimension_numbers = #tpu.dot_dimension_numbers<[1], [0], [0], [1], [0, 0, 1, 1], [], []>} : vector<16x4xf32>, vector<4x24xf32>, vector<16x24xf32> -> vector<16x24xf32>
    %4 = tpu.iota {dimensions = array<i32: 1>} : vector<1x16x1xi32>
    %5 = vector.shape_cast %4 : vector<1x16x1xi32> to vector<16x1xi32>
    %6 = vector.extract_strided_slice %3 {offsets = [0, 8], sizes = [16, 8], strides = [1, 1]} : vector<16x24xf32> to vector<16x8xf32>
    %7 = vector.extract_strided_slice %3 {offsets = [0, 0], sizes = [16, 8], strides = [1, 1]} : vector<16x24xf32> to vector<16x8xf32>
    %c1_i32 = arith.constant 1 : i32
    %8 = tpu.dynamic_rotate %7 by %c1_i32 dim 0 : vector<16x8xf32>, i32 -> vector<16x8xf32>
    %c1_i32_4 = arith.constant 1 : i32
    %9 = vector.broadcast %c1_i32_4 : i32 to vector<16x1xi32>
    %10 = arith.cmpi sge, %5, %9 : vector<16x1xi32>
    %cst_5 = arith.constant 0.000000e+00 : f32
    %11 = vector.shape_cast %10 : vector<16x1xi1> to vector<16x1xi1>
    %12 = vector.broadcast %11 : vector<16x1xi1> to vector<16x8xi1>
    %13 = vector.broadcast %cst_5 : f32 to vector<16x8xf32>
    %14 = arith.select %12, %8, %13 : vector<16x8xi1>, vector<16x8xf32>
    %15 = arith.addf %6, %14 : vector<16x8xf32>
    %16 = vector.extract_strided_slice %3 {offsets = [0, 16], sizes = [16, 8], strides = [1, 1]} : vector<16x24xf32> to vector<16x8xf32>
    %c15_i32 = arith.constant 15 : i32
    %17 = tpu.dynamic_rotate %16 by %c15_i32 dim 0 : vector<16x8xf32>, i32 -> vector<16x8xf32>
    %c14_i32 = arith.constant 14 : i32
    %18 = vector.broadcast %c14_i32 : i32 to vector<16x1xi32>
    %19 = arith.cmpi sle, %5, %18 : vector<16x1xi32>
    %cst_6 = arith.constant 0.000000e+00 : f32
    %20 = vector.shape_cast %19 : vector<16x1xi1> to vector<16x1xi1>
    %21 = vector.broadcast %20 : vector<16x1xi1> to vector<16x8xi1>
    %22 = vector.broadcast %cst_6 : f32 to vector<16x8xf32>
    %23 = arith.select %21, %17, %22 : vector<16x8xi1>, vector<16x8xf32>
    %24 = arith.addf %15, %23 : vector<16x8xf32>
    %c0_7 = arith.constant 0 : index
    %c0_8 = arith.constant 0 : index
    %25 = vector.load %arg4[%c0_7, %c0_8] : memref<1x8xf32, #tpu.memory_space<vmem>>, vector<1x8xf32>
    %26 = vector.broadcast %25 : vector<1x8xf32> to vector<16x8xf32>
    %27 = arith.addf %24, %26 : vector<16x8xf32>
    %c0_9 = arith.constant 0 : index
    %c0_10 = arith.constant 0 : index
    %c0_11 = arith.constant 0 : index
    %28 = vector.load %arg2[%c0_9, %c0_10, %c0_11] : memref<1x16x1xf32, #tpu.memory_space<vmem>>, vector<1x16x1xf32>
    %29 = vector.shape_cast %28 : vector<1x16x1xf32> to vector<16x1xf32>
    %30 = vector.broadcast %29 : vector<16x1xf32> to vector<16x8xf32>
    %31 = arith.mulf %27, %30 : vector<16x8xf32>
    %32 = vector.shape_cast %31 : vector<16x8xf32> to vector<1x16x8xf32>
    %c0_12 = arith.constant 0 : index
    %c0_13 = arith.constant 0 : index
    %c0_14 = arith.constant 0 : index
    %33 = vector.load %arg5[%c0_12, %c0_13, %c0_14] : memref<1x16x8xf32, #tpu.memory_space<vmem>>, vector<1x16x8xf32>
    tpu.vector_store %arg5[%c0_12, %c0_13, %c0_14], %32 {strides = array<i32>} : memref<1x16x8xf32, #tpu.memory_space<vmem>>, vector<1x16x8xf32>,
    return
  }
  func.func @transform_0(%arg0: i32) -> (i32, i32, i32) {
    %c0_i32 = arith.constant 0 : i32
    %c0_i32_0 = arith.constant 0 : i32
    %c0_i32_1 = arith.constant 0 : i32
    return %arg0, %c0_i32, %c0_i32_0 : i32, i32, i32
  }
  func.func @transform_1(%arg0: i32) -> (i32, i32, i32) {
    %c0_i32 = arith.constant 0 : i32
    %c0_i32_0 = arith.constant 0 : i32
    %c0_i32_1 = arith.constant 0 : i32
    return %arg0, %c0_i32, %c0_i32_0 : i32, i32, i32
  }
  func.func @transform_2(%arg0: i32) -> (i32, i32) {
    %c0_i32 = arith.constant 0 : i32
    %c0_i32_0 = arith.constant 0 : i32
    %c0_i32_1 = arith.constant 0 : i32
    return %c0_i32, %c0_i32_0 : i32, i32
  }
  func.func @transform_3(%arg0: i32) -> (i32, i32) {
    %c0_i32 = arith.constant 0 : i32
    %c0_i32_0 = arith.constant 0 : i32
    %c0_i32_1 = arith.constant 0 : i32
    return %c0_i32, %c0_i32_0 : i32, i32
  }
  func.func @transform_4(%arg0: i32) -> (i32, i32, i32) {
    %c0_i32 = arith.constant 0 : i32
    %c0_i32_0 = arith.constant 0 : i32
    %c0_i32_1 = arith.constant 0 : i32
    return %arg0, %c0_i32, %c0_i32_0 : i32, i32, i32
  }
}

</mosaic_0001>

<bundles_post_ra>
// kernel: tpu_custom_call.1
= control target key start
LH: loop header
LB: loop body
LE: loop exit
PB: predicated region body
PF: predicated region fallthrough
CT: control target
= control target key end

     0   :  { %s546_s15 = smov 0   ;;  %s577_s0 = inlined_call_operand.vmem [shape: f32[2,16,4], index: 0, kind: input, shape index: {}]   ;;  %s578_s1 = inlined_call_operand.vmem [shape: f32[2,16,1], index: 1, kind: input, shape index: {}]   ;;  %s579_s2 = inlined_call_operand.vmem [shape: f32[4,24], index: 2, kind: input, shape index: {}]   ;;  %s580_s3 = inlined_call_operand.vmem [shape: f32[1,8], index: 3, kind: input, shape index: {}]   ;;  %s581_s4 = inlined_call_operand.vmem [shape: f32[2,16,8], index: 4, kind: output, shape index: {}]  }
   0x1 LB: > { %s467_s16 = sadd.s32 4294967295, %s515_s15   ;;  %p471_p0 = scmp.ge.s32.totalorder %s515_s15, 1  ;;  %s515_s15 = sphi %s546_s15, %s14_s15  }
   0x2   : > { %p172_p1 = scmp.lt.s32.totalorder %s515_s15, 3 }
   0x4   : > { %p173_p2 = pnand %p471_p0, %p172_p1 }
   0x5   : > { %v220_v0 = vld [vmem:[%s579_s2] sm:$0xf] (!%p173_p2)  ;;  %vm228_vm0 = vcmask (!%p173_p2), 1043456   ;;  %p203_p3 = scmp.lt.s32.totalorder (!%p173_p2), %s467_s16, 1  ;;  %v517_v1 = vmov (!%p173_p2), 0   ;;  %vm221_vm1 = vcmask (!%p173_p2), 31744   ;;  %v307_v6 = vlaneseq (!%p173_p2) }
   0x6   : > { %176 = sbr.rel (%p173_p2) target bundleno = 592 (0x250), region = 36  ;;  %490 = vmatprep.subr.msk.mxu0 (!%p173_p2), %vm228_vm0, %v220_v0  ;;  %507 = vset.pattern.permute.xlu1 (!%p173_p2), %v517_v1  ;;  %s518_s26 = smov (!%p173_p2), 112   ;;  %v481_v23 = vld [vmem:[%s580_s3] ss:$0 sm:$0xff] (!%p173_p2)  ;;  %vm397_vm6 = vcmask (!%p173_p2), 64512  }
   0x7   : > { %491 = vmatpush3.msk.msra.mxu0 (!%p173_p2), %vm228_vm0, %v220_v0  ;;  %508 = vset.pattern.permute.xlu0 (!%p173_p2), %v517_v1  ;;  %v308_v7 = vshrl.u32 (!%p173_p2), %v307_v6, 7  ;;  %s519_s27 = smov (!%p173_p2), 8   ;;  %s520_s30 = smov (!%p173_p2), 120  }
   0x9   : > { %vm312_vm2 = vcmp.lt.s32.totalorder (!%p173_p2), %v308_v7, 1  ;;  %vm315_vm3 = vcmp.ge.s32.totalorder (!%p173_p2), %v308_v7, 1  ;;  %v309_v16 = vadd.s32 (!%p173_p2), 8, %v308_v7  ;;  %vm343_vm4 = vcmp.lt.s32.totalorder (!%p173_p2), %v308_v7, 7 }
   0xb   : > { %vm347_vm5 = vcmp.le.s32.totalorder (!%p173_p2), %v309_v16, 14 }
   0xd   : > { %s583_s16 = smov (!%p203_p3, %s467_s16), 1 }
   0xe   : > { %s557_s19 = sshll.u32 %s583_s16, 4 }
   0xf   : > { %s207_s22 = scalar_lea.vmem %s577_s0, %s557_s19  ;;  %s212_s25 = scalar_lea.vmem %s578_s1, %s557_s19 }
  0x10   : > { %v218_v2 = vld [vmem:[%s207_s22] sm:$0xff]  ;;  %v219_v3 = vld [vmem:[%s207_s22 + $0x8] sm:$0xff]  ;;  %s217_s7 = scalar_lea.vmem %s581_s4, %s557_s19 }
  0x11   : > { %v375_v4 = vld [vmem:[%s212_s25] sm:$0xff]  ;;  %492 = vmatprep.mubr.msk.f32.mxu0 %vm221_vm1, %v218_v2  ;;  %v376_v5 = vld [vmem:[%s212_s25 + $0x8] sm:$0xff] }
  0x12   : > { %379 = vperm.xlu1 %507, %v375_v4   ;;  %493 = vmatmul.mubr.msk.f32.vlgmr.msra.gmra.mrb[0].mxu0 %vm221_vm1, %v219_v3 }
  0x16   : > { %384 = vperm.xlu1 %507, %v376_v5  }
  0x91   : > { %v380_v24 = vpop.permute.xlu1 %379 }
  0x95   : > { %v385_v25 = vpop.permute.xlu1 %384 }
  0xe5   : > { %v494_v8 = vpop.f32.mrb[0].mxu0 }
  0xe6   : > { %v311_v9 = vrot.slane %v494_v8, 7  ;;  %v298_v10 = vpop.f32.mrb[1].mxu0 }
  0xe7   : > { %v310_v11 = vrot.slane %v298_v10, 7  ;;  %335 = vrot.lane.b32.xlu0 %v298_v10, %s518_s26 }
  0xe9   : > { %v313_v12 = vsel %vm312_vm2, %v310_v11, %v311_v9  ;;  %v314_v13 = vsel %vm312_vm2, %v311_v9, %v310_v11 }
  0xea   : > { %327 = vrot.lane.b32.xlu1 %v313_v12, %s519_s27  ;;  %v321_v14 = vsel %vm315_vm3, %v314_v13, 0.0 }
  0xeb   : > { %337 = vrot.lane.b32.xlu0 %v494_v8, %s518_s26 }
  0xef   : > { %325 = vrot.lane.b32.xlu0 %v321_v14, %s519_s27 }
 0x159   : > { %v336_v15 = vpop.permute.xlu0 %335 }
 0x15a   : > { %v341_v18 = vrot.slane %v336_v15, 1 }
 0x15c   : > { %v328_v27 = vpop.permute.xlu1 %327 }
 0x15d   : > { %v338_v17 = vpop.permute.xlu0 %337  ;;  %v332_v28 = vadd.f32 %v494_v8, %v328_v27 }
 0x15e   : > { %v342_v19 = vrot.slane %v338_v17, 1 }
 0x160   : > { %v344_v20 = vsel %vm343_vm4, %v341_v18, %v342_v19  ;;  %v345_v21 = vsel %vm343_vm4, %v342_v19, %v341_v18 }
 0x161   : > { %356 = vrot.lane.b32.xlu0 %v344_v20, %s519_s27  ;;  %v353_v22 = vsel %vm347_vm5, %v345_v21, 0.0  ;;  %v326_v26 = vpop.permute.xlu0 %325 }
 0x162   : > { %358 = vrot.lane.b32.xlu1 %v353_v22, %s519_s27  ;;  %v331_v30 = vadd.f32 %v326_v26, %v298_v10 }
 0x165   : > { %370 = vrot.lane.b32.xlu0 %v481_v23, %s519_s27 }
 0x1d3   : > { %v357_v29 = vpop.permute.xlu0 %356 }
 0x1d4   : > { %v359_v31 = vpop.permute.xlu1 %358  ;;  %v362_v33 = vadd.f32 %v357_v29, %v331_v30 }
 0x1d5   : > { %v363_v32 = vadd.f32 %v359_v31, %v332_v28 }
 0x1d7   : > { %v371_v34 = vpop.permute.xlu0 %370 }
 0x1d8   : > { %v373_v35 = vadd.f32 %v371_v34, %v362_v33  ;;  %v374_v36 = vadd.f32 %v371_v34, %v363_v32 }
 0x1da   : > { %v387_v37 = vmul.f32 %v380_v24, %v373_v35  ;;  %v388_v38 = vmul.f32 %v385_v25, %v374_v36 }
 0x1dc   : > { %391 = vrot.lane.b32.xlu1 %v387_v37, %s520_s30  ;;  %393 = vrot.lane.b32.xlu0 %v388_v38, %s520_s30 }
 0x24e   : > { %v394_v39 = vpop.permute.xlu0 %393  ;;  %v392_v40 = vpop.permute.xlu1 %391 }
 0x24f   : > { %399 = vst.msk [vmem:[%s217_s7 + $0x8] sm:$0xff] %vm397_vm6, %v394_v39  ;;  %398 = vst.msk [vmem:[%s217_s7] sm:$0xff] %vm397_vm6, %v392_v40 }
 0x250 PF: > { %s14_s15 = sadd.s32 1, %s515_s15  }
 0x251   : > { %p11_p4 = scmp.ge.s32.totalorder %s14_s15, 4  }
 0x253   :  { %13 = sbr.rel (!%p11_p4) target bundleno = 1 (0x1), region = 69 }

</bundles_post_ra>
